<compile_context>
chip_gen: v7x
topology: tpu7x:2x2x1
jax: 0.10.0
libtpu: 0.0.40
codegen_flags: <defaults>
</compile_context>

<pallas_src>
import jax
import jax.numpy as jnp
from jax.experimental import pallas as pl
from jax.experimental.pallas import tpu as pltpu

NEG_SLOPE = 0.01        # F.leaky_relu default negative_slope
IN_FEATURES = 2         # enc1 = nn.Linear(2, 32)
OUT_FEATURES = 4        # dec3 = nn.Linear(32, 4)
HIDDEN = 32
NUM_LAYERS = 6          # enc1, enc2, enc3, dec1, dec2, dec3
NUM_MXU_LAYERS = NUM_LAYERS - 1   # enc2..dec3 run on the MXU


def _leaky_relu(x):
    # max(x, slope*x) == leaky_relu(x) for slope in (0, 1); mul+max instead of
    # cmp+mul+select.
    return jnp.maximum(x, NEG_SLOPE * x)


def _ae_kernel(x_ref, w1_ref, wm_ref, b_ref, o_ref):
    """Blocks:
      x_ref : (2, T)  f32   input features x batch-on-lanes
      w1_ref: (32, 2) f32   enc1 weight (VPU path)
      wm_ref: (5, 32, 32) bf16  enc2, enc3, dec1, dec2, dec3 (zero padded)
      b_ref : (6, 32, 1) f32    all 6 biases (padded rows MUST stay zero)
      o_ref : (4, T)  f32
    """
    x0 = x_ref[0:1, :]                 # (1, T) f32
    x1 = x_ref[1:2, :]                 # (1, T) f32
    w1 = w1_ref[...]                   # (32, 2) f32

    # enc1: K=2, so do it on the VPU (broadcast FMAs) instead of padding the
    # MXU's systolic K dim from 2 to 128/256.
    h = w1[:, 0:1] * x0 + w1[:, 1:2] * x1 + b_ref[0]     # (32, T) f32
    h = _leaky_relu(h)

    # enc2 (dropout == identity in eval), enc3, dec1, dec2, dec3 on the MXU:
    # bf16 inputs, f32 accumulation, f32 bias add.  Zero-padded weight rows /
    # bias rows stay exactly zero through leaky_relu, so padding is exact.
    # TODO(synk): training-mode dropout (pltpu.prng_random_bits mask) not implemented.
    for l in range(NUM_MXU_LAYERS):
        h = jnp.dot(wm_ref[l], h.astype(jnp.bfloat16),
                    preferred_element_type=jnp.float32) + b_ref[l + 1]
        if l < NUM_MXU_LAYERS - 1:      # no activation after dec3
            h = _leaky_relu(h)

    o_ref[...] = h[:OUT_FEATURES, :].astype(o_ref.dtype)


def init_params(key, b=3):
    """PyTorch nn.Linear init: W (out,in), bias (out,), U(-1/sqrt(fan_in), +)."""
    layer_dims = [(IN_FEATURES, HIDDEN), (HIDDEN, HIDDEN), (HIDDEN, b),
                  (b, HIDDEN), (HIDDEN, HIDDEN), (HIDDEN, OUT_FEATURES)]
    params = []
    for fan_in, fan_out in layer_dims:
        key, kw, kb = jax.random.split(key, 3)
        bound = 1.0 / float(fan_in) ** 0.5
        w = jax.random.uniform(kw, (fan_out, fan_in), jnp.float32, -bound, bound)
        bias = jax.random.uniform(kb, (fan_out,), jnp.float32, -bound, bound)
        params.append((w, bias))
    return params


def pack_params(params):
    """Pack the 6 heterogeneous (W, b) pairs for the kernel.

    Returns:
      w1      : (32, 2)      f32   enc1 weight (VPU path, stays f32)
      w_stack : (5, 32, 32)  bf16  enc2..dec3, zero padded to 32x32
      b_stack : (6, 32, 1)   f32   all biases, zero padded rows

    Padded weight/bias rows are zero and leaky_relu(0) == 0, so padded hidden
    rows never contaminate real ones.  Padded-row biases must remain zero.
    """
    assert len(params) == NUM_LAYERS
    w1 = params[0][0].astype(jnp.float32)                       # (32, 2)
    w_stack = jnp.zeros((NUM_MXU_LAYERS, HIDDEN, HIDDEN), jnp.float32)
    b_stack = jnp.zeros((NUM_LAYERS, HIDDEN, 1), jnp.float32)
    b_stack = b_stack.at[0, :HIDDEN, 0].set(params[0][1])
    for l in range(1, NUM_LAYERS):
        w, bias = params[l]
        out_f, in_f = w.shape
        w_stack = w_stack.at[l - 1, :out_f, :in_f].set(w)
        b_stack = b_stack.at[l, :out_f, 0].set(bias)
    return w1, w_stack.astype(jnp.bfloat16), b_stack


def autoencoder_forward(x, w1, w_stack, b_stack, tile_n=16384):
    """x: (N, 2) float32 -> (N, 4) float32."""
    N, F = x.shape
    assert F == IN_FEATURES

    # Batch-on-lanes tiling: tile is a multiple of 128 lanes.
    lane_n = pl.cdiv(N, 128) * 128
    num_tiles = pl.cdiv(lane_n, max(128, tile_n))
    if lane_n >= 2 * 128:
        # Keep both v7x TensorCores busy: at least 2 steps on the parallel axis.
        num_tiles = max(num_tiles, 2)
    tile_n = pl.cdiv(lane_n, num_tiles * 128) * 128
    padded_n = num_tiles * tile_n
    grid = (num_tiles,)

    # Batch on the lane axis; pad fused with the transpose (single XLA copy).
    # TODO(synk): this transpose and the output transpose below each cost one
    # extra HBM pass; removing them needs in-kernel stride-2 lane de-interleave
    # / 4-way lane interleave of the (N,2)/(N,4) row-major layouts.
    x_t = jnp.pad(x.T, ((0, 0), (0, padded_n - N)))

    out_t = pl.pallas_call(
        _ae_kernel,
        out_shape=jax.ShapeDtypeStruct((OUT_FEATURES, padded_n), jnp.float32),
        grid_spec=pltpu.PrefetchScalarGridSpec(
            num_scalar_prefetch=0,
            grid=grid,
            in_specs=[
                pl.BlockSpec((IN_FEATURES, tile_n), lambda i: (0, i)),
                # Parameters: constant index_map -> VMEM resident, no per-step DMA.
                pl.BlockSpec((HIDDEN, IN_FEATURES), lambda i: (0, 0)),
                pl.BlockSpec((NUM_MXU_LAYERS, HIDDEN, HIDDEN), lambda i: (0, 0, 0)),
                pl.BlockSpec((NUM_LAYERS, HIDDEN, 1), lambda i: (0, 0, 0)),
            ],
            out_specs=pl.BlockSpec((OUT_FEATURES, tile_n), lambda i: (0, i)),
        ),
        compiler_params=pltpu.CompilerParams(
            dimension_semantics=("parallel",),
            # Headroom for 16K-lane tiles + layer intermediates on v5e's smaller
            # default scoped limit; still <= physical VMEM on all generations.
            vmem_limit_bytes=48 * 1024 * 1024),
    )(x_t, w1, w_stack, b_stack)

    return out_t[:, :N].T


def _reference_forward(x, params):
    h = x
    for li, (w, bias) in enumerate(params):
        h = h @ w.T + bias
        if li < len(params) - 1:
            h = jnp.where(h >= 0, h, NEG_SLOPE * h)
    return h


if __name__ == "__main__":
    key = jax.random.PRNGKey(0)
    kx, kp = jax.random.split(key)

    N = 300  # small batch; exercises a 2-step grid and a ragged (padded) last tile
    x = jax.random.normal(kx, (N, IN_FEATURES), dtype=jnp.float32)
    params = init_params(kp, b=3)
    w1, w_stack, b_stack = pack_params(params)

    y = autoencoder_forward(x, w1, w_stack, b_stack)
    y = jax.block_until_ready(y)

    y_ref = _reference_forward(x, params)
    assert y.shape == (N, OUT_FEATURES)
    # bf16 MXU inputs (f32 accumulation) vs the f32 reference -> relaxed tolerance.
    assert jnp.allclose(y, y_ref, atol=5e-2, rtol=5e-2), "mismatch vs reference"

    print("KERNEL_OK")
</pallas_src>

<mosaic_0001>
module attributes {stable_mosaic.version = 11 : i64} {
  func.func @_ae_kernel(%arg0: i32, %arg1: memref<2x256xf32, #tpu.memory_space<vmem>>, %arg2: memref<32x2xf32, #tpu.memory_space<vmem>>, %arg3: memref<5x32x32xbf16, #tpu.memory_space<vmem>>, %arg4: memref<6x32x1xf32, #tpu.memory_space<vmem>>, %arg5: memref<4x256xf32, #tpu.memory_space<vmem>>) attributes {dimension_semantics = [#tpu.dimension_semantics<parallel>], iteration_bounds = array<i64: 2>, scalar_prefetch = 0 : i64, scratch_operands = 0 : i64, tpu.core_type = #tpu.core_type<tc>, window_params = [{transform_indices = @transform_0, window_bounds = array<i64: 2, 256>}, {pipeline_mode = #tpu.pipeline_mode<synchronous>, transform_indices = @transform_1, window_bounds = array<i64: 32, 2>}, {pipeline_mode = #tpu.pipeline_mode<synchronous>, transform_indices = @transform_2, window_bounds = array<i64: 5, 32, 32>}, {pipeline_mode = #tpu.pipeline_mode<synchronous>, transform_indices = @transform_3, window_bounds = array<i64: 6, 32, 1>}, {transform_indices = @transform_4, window_bounds = array<i64: 4, 256>}]} {
    %c0 = arith.constant 0 : index
    %c0_0 = arith.constant 0 : index
    %0 = vector.load %arg1[%c0, %c0_0] : memref<2x256xf32, #tpu.memory_space<vmem>>, vector<1x256xf32>
    %c1 = arith.constant 1 : index
    %c0_1 = arith.constant 0 : index
    %1 = vector.load %arg1[%c1, %c0_1] : memref<2x256xf32, #tpu.memory_space<vmem>>, vector<1x256xf32>
    %c0_2 = arith.constant 0 : index
    %c0_3 = arith.constant 0 : index
    %2 = vector.load %arg2[%c0_2, %c0_3] : memref<32x2xf32, #tpu.memory_space<vmem>>, vector<32x2xf32>
    %3 = vector.extract_strided_slice %2 {offsets = [0, 0], sizes = [32, 1], strides = [1, 1]} : vector<32x2xf32> to vector<32x1xf32>
    %4 = vector.broadcast %3 : vector<32x1xf32> to vector<32x256xf32>
    %5 = vector.broadcast %0 : vector<1x256xf32> to vector<32x256xf32>
    %6 = arith.mulf %4, %5 : vector<32x256xf32>
    %7 = vector.extract_strided_slice %2 {offsets = [0, 1], sizes = [32, 1], strides = [1, 1]} : vector<32x2xf32> to vector<32x1xf32>
    %8 = vector.broadcast %7 : vector<32x1xf32> to vector<32x256xf32>
    %9 = vector.broadcast %1 : vector<1x256xf32> to vector<32x256xf32>
    %10 = arith.mulf %8, %9 : vector<32x256xf32>
    %11 = arith.addf %6, %10 : vector<32x256xf32>
    %c0_4 = arith.constant 0 : index
    %c0_5 = arith.constant 0 : index
    %c0_6 = arith.constant 0 : index
    %12 = vector.load %arg4[%c0_4, %c0_5, %c0_6] : memref<6x32x1xf32, #tpu.memory_space<vmem>>, vector<1x32x1xf32>
    %13 = vector.shape_cast %12 : vector<1x32x1xf32> to vector<32x1xf32>
    %14 = vector.broadcast %13 : vector<32x1xf32> to vector<32x256xf32>
    %15 = arith.addf %11, %14 : vector<32x256xf32>
    %cst = arith.constant 0.00999999977 : f32
    %16 = vector.broadcast %cst : f32 to vector<32x256xf32>
    %17 = arith.mulf %16, %15 : vector<32x256xf32>
    %18 = arith.maximumf %15, %17 : vector<32x256xf32>
    %c0_7 = arith.constant 0 : index
    %c0_8 = arith.constant 0 : index
    %c0_9 = arith.constant 0 : index
    %19 = vector.load %arg3[%c0_7, %c0_8, %c0_9] : memref<5x32x32xbf16, #tpu.memory_space<vmem>>, vector<1x32x32xbf16>
    %20 = vector.shape_cast %19 : vector<1x32x32xbf16> to vector<32x32xbf16>
    %21 = arith.truncf %18 : vector<32x256xf32> to vector<32x256xbf16>
    %cst_10 = arith.constant dense<0.000000e+00> : vector<32x256xf32>
    %22 = tpu.matmul %20, %21, %cst_10 {dimension_numbers = #tpu.dot_dimension_numbers<[1], [0], [0], [1], [0, 0, 1, 1], [], []>} : vector<32x32xbf16>, vector<32x256xbf16>, vector<32x256xf32> -> vector<32x256xf32>
    %c1_11 = arith.constant 1 : index
    %c0_12 = arith.constant 0 : index
    %c0_13 = arith.constant 0 : index
    %23 = vector.load %arg4[%c1_11, %c0_12, %c0_13] : memref<6x32x1xf32, #tpu.memory_space<vmem>>, vector<1x32x1xf32>
    %24 = vector.shape_cast %23 : vector<1x32x1xf32> to vector<32x1xf32>
    %25 = vector.broadcast %24 : vector<32x1xf32> to vector<32x256xf32>
    %26 = arith.addf %22, %25 : vector<32x256xf32>
    %cst_14 = arith.constant 0.00999999977 : f32
    %27 = vector.broadcast %cst_14 : f32 to vector<32x256xf32>
    %28 = arith.mulf %27, %26 : vector<32x256xf32>
    %29 = arith.maximumf %26, %28 : vector<32x256xf32>
    %c1_15 = arith.constant 1 : index
    %c0_16 = arith.constant 0 : index
    %c0_17 = arith.constant 0 : index
    %30 = vector.load %arg3[%c1_15, %c0_16, %c0_17] : memref<5x32x32xbf16, #tpu.memory_space<vmem>>, vector<1x32x32xbf16>
    %31 = vector.shape_cast %30 : vector<1x32x32xbf16> to vector<32x32xbf16>
    %32 = arith.truncf %29 : vector<32x256xf32> to vector<32x256xbf16>
    %cst_18 = arith.constant dense<0.000000e+00> : vector<32x256xf32>
    %33 = tpu.matmul %31, %32, %cst_18 {dimension_numbers = #tpu.dot_dimension_numbers<[1], [0], [0], [1], [0, 0, 1, 1], [], []>} : vector<32x32xbf16>, vector<32x256xbf16>, vector<32x256xf32> -> vector<32x256xf32>
    %c2 = arith.constant 2 : index
    %c0_19 = arith.constant 0 : index
    %c0_20 = arith.constant 0 : index
    %34 = vector.load %arg4[%c2, %c0_19, %c0_20] : memref<6x32x1xf32, #tpu.memory_space<vmem>>, vector<1x32x1xf32>
    %35 = vector.shape_cast %34 : vector<1x32x1xf32> to vector<32x1xf32>
    %36 = vector.broadcast %35 : vector<32x1xf32> to vector<32x256xf32>
    %37 = arith.addf %33, %36 : vector<32x256xf32>
    %cst_21 = arith.constant 0.00999999977 : f32
    %38 = vector.broadcast %cst_21 : f32 to vector<32x256xf32>
    %39 = arith.mulf %38, %37 : vector<32x256xf32>
    %40 = arith.maximumf %37, %39 : vector<32x256xf32>
    %c2_22 = arith.constant 2 : index
    %c0_23 = arith.constant 0 : index
    %c0_24 = arith.constant 0 : index
    %41 = vector.load %arg3[%c2_22, %c0_23, %c0_24] : memref<5x32x32xbf16, #tpu.memory_space<vmem>>, vector<1x32x32xbf16>
    %42 = vector.shape_cast %41 : vector<1x32x32xbf16> to vector<32x32xbf16>
    %43 = arith.truncf %40 : vector<32x256xf32> to vector<32x256xbf16>
    %cst_25 = arith.constant dense<0.000000e+00> : vector<32x256xf32>
    %44 = tpu.matmul %42, %43, %cst_25 {dimension_numbers = #tpu.dot_dimension_numbers<[1], [0], [0], [1], [0, 0, 1, 1], [], []>} : vector<32x32xbf16>, vector<32x256xbf16>, vector<32x256xf32> -> vector<32x256xf32>
    %c3 = arith.constant 3 : index
    %c0_26 = arith.constant 0 : index
    %c0_27 = arith.constant 0 : index
    %45 = vector.load %arg4[%c3, %c0_26, %c0_27] : memref<6x32x1xf32, #tpu.memory_space<vmem>>, vector<1x32x1xf32>
    %46 = vector.shape_cast %45 : vector<1x32x1xf32> to vector<32x1xf32>
    %47 = vector.broadcast %46 : vector<32x1xf32> to vector<32x256xf32>
    %48 = arith.addf %44, %47 : vector<32x256xf32>
    %cst_28 = arith.constant 0.00999999977 : f32
    %49 = vector.broadcast %cst_28 : f32 to vector<32x256xf32>
    %50 = arith.mulf %49, %48 : vector<32x256xf32>
    %51 = arith.maximumf %48, %50 : vector<32x256xf32>
    %c3_29 = arith.constant 3 : index
    %c0_30 = arith.constant 0 : index
    %c0_31 = arith.constant 0 : index
    %52 = vector.load %arg3[%c3_29, %c0_30, %c0_31] : memref<5x32x32xbf16, #tpu.memory_space<vmem>>, vector<1x32x32xbf16>
    %53 = vector.shape_cast %52 : vector<1x32x32xbf16> to vector<32x32xbf16>
    %54 = arith.truncf %51 : vector<32x256xf32> to vector<32x256xbf16>
    %cst_32 = arith.constant dense<0.000000e+00> : vector<32x256xf32>
    %55 = tpu.matmul %53, %54, %cst_32 {dimension_numbers = #tpu.dot_dimension_numbers<[1], [0], [0], [1], [0, 0, 1, 1], [], []>} : vector<32x32xbf16>, vector<32x256xbf16>, vector<32x256xf32> -> vector<32x256xf32>
    %c4 = arith.constant 4 : index
    %c0_33 = arith.constant 0 : index
    %c0_34 = arith.constant 0 : index
    %56 = vector.load %arg4[%c4, %c0_33, %c0_34] : memref<6x32x1xf32, #tpu.memory_space<vmem>>, vector<1x32x1xf32>
    %57 = vector.shape_cast %56 : vector<1x32x1xf32> to vector<32x1xf32>
    %58 = vector.broadcast %57 : vector<32x1xf32> to vector<32x256xf32>
    %59 = arith.addf %55, %58 : vector<32x256xf32>
    %cst_35 = arith.constant 0.00999999977 : f32
    %60 = vector.broadcast %cst_35 : f32 to vector<32x256xf32>
    %61 = arith.mulf %60, %59 : vector<32x256xf32>
    %62 = arith.maximumf %59, %61 : vector<32x256xf32>
    %c4_36 = arith.constant 4 : index
    %c0_37 = arith.constant 0 : index
    %c0_38 = arith.constant 0 : index
    %63 = vector.load %arg3[%c4_36, %c0_37, %c0_38] : memref<5x32x32xbf16, #tpu.memory_space<vmem>>, vector<1x32x32xbf16>
    %64 = vector.shape_cast %63 : vector<1x32x32xbf16> to vector<32x32xbf16>
    %65 = arith.truncf %62 : vector<32x256xf32> to vector<32x256xbf16>
    %cst_39 = arith.constant dense<0.000000e+00> : vector<32x256xf32>
    %66 = tpu.matmul %64, %65, %cst_39 {dimension_numbers = #tpu.dot_dimension_numbers<[1], [0], [0], [1], [0, 0, 1, 1], [], []>} : vector<32x32xbf16>, vector<32x256xbf16>, vector<32x256xf32> -> vector<32x256xf32>
    %c5 = arith.constant 5 : index
    %c0_40 = arith.constant 0 : index
    %c0_41 = arith.constant 0 : index
    %67 = vector.load %arg4[%c5, %c0_40, %c0_41] : memref<6x32x1xf32, #tpu.memory_space<vmem>>, vector<1x32x1xf32>
    %68 = vector.shape_cast %67 : vector<1x32x1xf32> to vector<32x1xf32>
    %69 = vector.broadcast %68 : vector<32x1xf32> to vector<32x256xf32>
    %70 = arith.addf %66, %69 : vector<32x256xf32>
    %71 = vector.extract_strided_slice %70 {offsets = [0, 0], sizes = [4, 256], strides = [1, 1]} : vector<32x256xf32> to vector<4x256xf32>
    %c0_42 = arith.constant 0 : index
    %c0_43 = arith.constant 0 : index
    %72 = vector.load %arg5[%c0_42, %c0_43] : memref<4x256xf32, #tpu.memory_space<vmem>>, vector<4x256xf32>
    tpu.vector_store %arg5[%c0_42, %c0_43], %71 {strides = array<i32>} : memref<4x256xf32, #tpu.memory_space<vmem>>, vector<4x256xf32>,
    return
  }
  func.func @transform_0(%arg0: i32) -> (i32, i32) {
    %c0_i32 = arith.constant 0 : i32
    %c0_i32_0 = arith.constant 0 : i32
    return %c0_i32, %arg0 : i32, i32
  }
  func.func @transform_1(%arg0: i32) -> (i32, i32) {
    %c0_i32 = arith.constant 0 : i32
    %c0_i32_0 = arith.constant 0 : i32
    %c0_i32_1 = arith.constant 0 : i32
    return %c0_i32, %c0_i32_0 : i32, i32
  }
  func.func @transform_2(%arg0: i32) -> (i32, i32, i32) {
    %c0_i32 = arith.constant 0 : i32
    %c0_i32_0 = arith.constant 0 : i32
    %c0_i32_1 = arith.constant 0 : i32
    %c0_i32_2 = arith.constant 0 : i32
    return %c0_i32, %c0_i32_0, %c0_i32_1 : i32, i32, i32
  }
  func.func @transform_3(%arg0: i32) -> (i32, i32, i32) {
    %c0_i32 = arith.constant 0 : i32
    %c0_i32_0 = arith.constant 0 : i32
    %c0_i32_1 = arith.constant 0 : i32
    %c0_i32_2 = arith.constant 0 : i32
    return %c0_i32, %c0_i32_0, %c0_i32_1 : i32, i32, i32
  }
  func.func @transform_4(%arg0: i32) -> (i32, i32) {
    %c0_i32 = arith.constant 0 : i32
    %c0_i32_0 = arith.constant 0 : i32
    return %c0_i32, %arg0 : i32, i32
  }
}

</mosaic_0001>

<bundles_post_ra>
// kernel: tpu_custom_call.1
= control target key start
LH: loop header
LB: loop body
LE: loop exit
PB: predicated region body
PF: predicated region fallthrough
CT: control target
= control target key end

     0   :  { %9 = vsyncpa [#allocation3], 0  ;;  %s1436_s0 = inlined_call_operand.vmem [shape: f32[2,512], index: 0, kind: input, shape index: {}]   ;;  %s1437_s1 = inlined_call_operand.vmem [shape: f32[32,2], index: 1, kind: input, shape index: {}]   ;;  %s1438_s2 = inlined_call_operand.vmem [shape: bf16[5,32,32], index: 2, kind: input, shape index: {}]   ;;  %s1439_s3 = inlined_call_operand.vmem [shape: f32[6,32,1], index: 3, kind: input, shape index: {}]   ;;  %s1440_s4 = inlined_call_operand.hbm [shape: f32[4,512], index: 4, kind: output, shape index: {}]  }
   0x1   :  { %11 = vsyncpa [#allocation3 + $0x1], 0  ;;  %s1209_s15 = smov 0   ;;  %s1211_s16 = smov 0  }
   0x2   :  { %s1213_s17 = smov 0   ;;  %s1215_s18 = smov 0  }
   0x3 LB: > { %s1230_s19 = sadd.s32 4294967295, %s1179_s18   ;;  %s986_s20 = sadd.s32 4294967294, %s1179_s18   ;;  %s1179_s18 = sphi %s1215_s18, %s1446_s18   ;;  %s1175_s17 = sphi %s1213_s17, %s1445_s17   ;;  %s1171_s16 = sphi %s1211_s16, %s1444_s16   ;;  %s1167_s15 = sphi %s1209_s15, %s1443_s15  }
   0x4   : > { %s1234_s21 = sadd.s32 1, %s1179_s18   ;;  %s113_s22 = sadd.s32 1, %s1175_s17 }
   0x5   : > { %s110_s23 = ssub.s32 %s1179_s18, %s1234_s21  ;;  %p123_p0 = scmp.ne.s32.totalorder %s1175_s17, %s1171_s16 }
   0x6   : > { %p111_p1 = scmp.eq.s32.totalorder %s110_s23, 0  ;;  %p124_p2 = scmp.eq.s32.totalorder %s1230_s19, 1 }
   0x7   : > { %p129_p3 = scmp.ne.s32.totalorder %s1171_s16, %s1167_s15  ;;  %p130_p4 = scmp.eq.s32.totalorder %s986_s20, 1 }
   0x8   : > { %s1245_s24 = scalar_select %p111_p1, %s1175_s17, %s113_s22  }
   0x9   : > { %p1247_p5 = por %p124_p2, %p123_p0  ;;  %p1251_p6 = por %p130_p4, %p129_p3 }
   0xa   : > { %p989_p7 = scmp.ge.s32.totalorder %s1179_s18, 1  ;;  %p166_p8 = scmp.lt.s32.totalorder %s1179_s18, 3 }
   0xc   : > { %p167_p9 = pnand %p989_p7, %p166_p8 }
   0xd   : > { %v205_v0 = vld [vmem:[%s1437_s1 + $0x10] sm:$0xff] (!%p167_p9)  ;;  %v203_v1 = vld [vmem:[%s1437_s1] sm:$0xff] (!%p167_p9)  ;;  %v1181_v2 = vmov (!%p167_p9), 1   ;;  %v204_v3 = vld [vmem:[%s1437_s1 + $0x8] sm:$0xff] (!%p167_p9)  ;;  %v1182_v4 = vmov (!%p167_p9), 0   ;;  %s991_s23 = sshll.u32 (!%p167_p9), %s1230_s19, 1  ;;  %v228_v27 = vlaneseq (!%p167_p9) }
   0xe   : > { %170 = sbr.rel (%p167_p9) target bundleno = 1352 (0x548), region = 36  ;;  %1103 = vset.pattern.permute.xlu0 (!%p167_p9), %v1181_v2  ;;  %1101 = vset.pattern.permute.xlu1 (!%p167_p9), %v1181_v2  ;;  %v206_v5 = vld [vmem:[%s1437_s1 + $0x18] sm:$0xff] (!%p167_p9)  ;;  %v290_v6 = vld [vmem:[%s1439_s3 + $0x8] sm:$0xff] (!%p167_p9)  ;;  %v289_v7 = vld [vmem:[%s1439_s3] sm:$0xff] (!%p167_p9)  ;;  %p193_p10 = scmp.lt.s32.totalorder (!%p167_p9), %s991_s23, 3  ;;  %vm380_vm0 = vcmask (!%p167_p9), 261120  }
   0xf   : > { %255 = vperm.xlu0 (!%p167_p9), %1103, %v205_v0   ;;  %247 = vperm.xlu1 (!%p167_p9), %1101, %v203_v1   ;;  %v994_v8 = vld [vmem:[%s1439_s3 + $0x20] sm:$0xff] (!%p167_p9)  ;;  %v291_v9 = vld [vmem:[%s1439_s3 + $0x10] sm:$0xff] (!%p167_p9)  ;;  %v292_v11 = vld [vmem:[%s1439_s3 + $0x18] sm:$0xff] (!%p167_p9)  ;;  %v229_v30 = vshrl.u32 (!%p167_p9), %v228_v27, 7  ;;  %s189_s8 = sand.u32 (!%p167_p9), 1, %s1171_s16   ;;  %s1055_s10 = sshll.u32 (!%p167_p9), %s1230_s19, 7 }
  0x10   : > { %419 = vmatprep.mubr.bf16.mxu0 (!%p167_p9), %v1182_v4  ;;  %429 = vmatprep.mubr.bf16.mxu1 (!%p167_p9), %v1182_v4  ;;  %v996_v10 = vld [vmem:[%s1439_s3 + $0x30] sm:$0xff] (!%p167_p9)  ;;  %v1006_v12 = vld [vmem:[%s1439_s3 + $0x40] sm:$0xff] (!%p167_p9)  ;;  %v995_v13 = vld [vmem:[%s1439_s3 + $0x28] sm:$0xff] (!%p167_p9)  ;;  %s990_s9 = sshll.u32 (!%p167_p9), %s189_s8, 3  ;;  %s1394_s20 = scalar_lea.hbm (!%p167_p9), %s1440_s4, %s1055_s10 }
  0x11   : > { %v1008_v14 = vld [vmem:[%s1439_s3 + $0x50] sm:$0xff] (!%p167_p9)  ;;  %v997_v15 = vld [vmem:[%s1439_s3 + $0x38] sm:$0xff] (!%p167_p9)  ;;  %v1018_v16 = vld [vmem:[%s1439_s3 + $0x60] sm:$0xff] (!%p167_p9)  ;;  %v230_v34 = vsub.s32 (!%p167_p9), 0, %v229_v30  ;;  %v234_v35 = vsub.s32 (!%p167_p9), 1, %v229_v30  ;;  %s191_s11 = scalar_lea.vmem (!%p167_p9), [#allocation2], %s990_s9 }
  0x12   : > { %v1007_v17 = vld [vmem:[%s1439_s3 + $0x48] sm:$0xff] (!%p167_p9)  ;;  %v1020_v18 = vld [vmem:[%s1439_s3 + $0x70] sm:$0xff] (!%p167_p9)  ;;  %v1009_v19 = vld [vmem:[%s1439_s3 + $0x58] sm:$0xff] (!%p167_p9)  ;;  %s927_s12 = sshll.u32 (!%p167_p9), %s191_s11, 4  ;;  %s913_s22 = scalar_lea.sflag (!%p167_p9), [#allocation3], %s189_s8  ;;  %s1396_s12 = int_to_ptr.vmem [resolvable:$true] %s927_s12 }
  0x13   : > { %1104 = vset.pattern.permute.xlu0 (!%p167_p9), %v1182_v4  ;;  %251 = vperm.xlu1 (!%p167_p9), %1101, %v204_v3   ;;  %v1030_v20 = vld [vmem:[%s1439_s3 + $0x80] sm:$0xff] (!%p167_p9)  ;;  %v1019_v21 = vld [vmem:[%s1439_s3 + $0x68] sm:$0xff] (!%p167_p9)  ;;  %v1032_v22 = vld [vmem:[%s1439_s3 + $0x90] sm:$0xff] (!%p167_p9)  ;;  %s1183_s19 = smov (!%p167_p9), [#allocation2]  }
  0x14   : > { %209 = vperm.xlu0 (!%p167_p9), %1104, %v203_v1   ;;  %v1021_v23 = vld [vmem:[%s1439_s3 + $0x78] sm:$0xff] (!%p167_p9)  ;;  %v1042_v24 = vld [vmem:[%s1439_s3 + $0xa0] sm:$0xff] (!%p167_p9)  ;;  %v1031_v25 = vld [vmem:[%s1439_s3 + $0x88] sm:$0xff] (!%p167_p9) }
  0x15   : > { %v1033_v26 = vld [vmem:[%s1439_s3 + $0x98] sm:$0xff]  ;;  %s1448_s23 = smov (!%p193_p10, %s991_s23), 3 }
  0x16   : > { %s992_s27 = sshll.u32 %s1448_s23, 1  ;;  %s1117_s23 = scalar_lea.vmem %s1396_s12, 128 }
  0x17   : > { %1102 = vset.pattern.permute.xlu1 %v1182_v4  ;;  %s196_s30 = scalar_lea.vmem %s1436_s0, %s992_s27  ;;  %p1118_p11 = scmp.ne.s32.totalorder %s1396_s12, %s1117_s23 }
  0x18   : > { %214 = vperm.xlu0 %1104, %v204_v3   ;;  %224 = vperm.xlu1 %1102, %v206_v5   ;;  %v200_v33 = vld [vmem:[%s196_s30] ss:$2 sm:$0x3]  ;;  %v993_v36 = vld [vmem:[%s196_s30 + $0x1] ss:$2 sm:$0x3] }
  0x19   : > { %v231_v37 = vrot.slane %v200_v33, %v230_v34  ;;  %v235_v38 = vrot.slane %v200_v33, %v234_v35  ;;  %v266_v41 = vrot.slane %v993_v36, %v230_v34  ;;  %v270_v42 = vrot.slane %v993_v36, %v234_v35  ;;  %p1119_p12 = pnand %p1118_p11, %p1247_p5  ;;  %s1121_s27 = sshll.u32 %s1183_s19, 4  ;;  %s1122_s27 = int_to_ptr.vmem [resolvable:$false] %s1121_s27 }
  0x1a   : > { %s1123_s28 = scalar_lea.vmem %s1122_s27, 256  ;;  %p1124_p0 = scmp.lt.s32.totalorder %s1396_s12, %s1122_s27 }
  0x1b   : > { %p1120_p13 = pneg %p1119_p12  ;;  %p1125_p1 = scmp.lt.s32.totalorder %s1123_s28, %s1117_s23 }
  0x1c   : > { %219 = vperm.xlu0 %1104, %v205_v0   ;;  %1105 = vset.pattern.permute.xlu1 %v1181_v2 }
  0x1d   : > { %259 = vperm.xlu1 %1105, %v206_v5   ;;  %p1126_p2 = por %p1125_p1, %p1124_p0 }
  0x1f   : > { %p1127_p3 = pnand %p1126_p2, %p1120_p13 }
  0x20   : > { %300 = vperm.xlu0 %1104, %v290_v6  }
  0x21   : > { %1106 = vset.pattern.permute.xlu1 %v1182_v4 }
  0x22   : > { %295 = vperm.xlu1 %1106, %v289_v7  }
  0x24   : > { %352 = vperm.xlu0 %1104, %v994_v8  }
  0x26   : > { %305 = vperm.xlu1 %1106, %v291_v9  }
  0x28   : > { %362 = vperm.xlu0 %1104, %v996_v10  }
  0x2a   : > { %310 = vperm.xlu1 %1106, %v292_v11  }
  0x2c   : > { %472 = vperm.xlu0 %1104, %v1006_v12  }
  0x2e   : > { %357 = vperm.xlu1 %1106, %v995_v13  }
  0x30   : > { %482 = vperm.xlu0 %1104, %v1008_v14  }
  0x32   : > { %367 = vperm.xlu1 %1106, %v997_v15  }
  0x34   : > { %591 = vperm.xlu0 %1104, %v1018_v16  }
  0x36   : > { %477 = vperm.xlu1 %1106, %v1007_v17  }
  0x38   : > { %601 = vperm.xlu0 %1104, %v1020_v18  }
  0x3a   : > { %487 = vperm.xlu1 %1106, %v1009_v19  }
  0x3c   : > { %710 = vperm.xlu0 %1104, %v1030_v20  }
  0x3e   : > { %596 = vperm.xlu1 %1106, %v1019_v21  }
  0x40   : > { %720 = vperm.xlu0 %1104, %v1032_v22  }
  0x42   : > { %606 = vperm.xlu1 %1106, %v1021_v23  }
  0x44   : > { %829 = vperm.xlu0 %1104, %v1042_v24  }
  0x46   : > { %715 = vperm.xlu1 %1106, %v1031_v25  }
  0x4a   : > { %725 = vperm.xlu1 %1106, %v1033_v26  }
  0x8e   : > { %v248_v28 = vpop.permute.xlu1 %247  ;;  %v256_v29 = vpop.permute.xlu0 %255 }
  0x8f   : > { %v273_v51 = vmul.f32 %v266_v41, %v248_v28  ;;  %v274_v52 = vmul.f32 %v270_v42, %v248_v28  ;;  %v277_v62 = vmul.f32 %v266_v41, %v256_v29  ;;  %v278_v63 = vmul.f32 %v270_v42, %v256_v29 }
  0x92   : > { %v252_v31 = vpop.permute.xlu1 %251 }
  0x93   : > { %v210_v32 = vpop.permute.xlu0 %209  ;;  %v275_v48 = vmul.f32 %v266_v41, %v252_v31  ;;  %v276_v49 = vmul.f32 %v270_v42, %v252_v31 }
  0x94   : > { %v238_v45 = vmul.f32 %v231_v37, %v210_v32  ;;  %v239_v46 = vmul.f32 %v235_v38, %v210_v32 }
  0x96   : > { %v281_v56 = vadd.f32 %v273_v51, %v238_v45  ;;  %v282_v57 = vadd.f32 %v274_v52, %v239_v46 }
  0x97   : > { %v215_v39 = vpop.permute.xlu0 %214  ;;  %v225_v40 = vpop.permute.xlu1 %224 }
  0x98   : > { %v240_v43 = vmul.f32 %v231_v37, %v215_v39  ;;  %v241_v44 = vmul.f32 %v235_v38, %v215_v39  ;;  %v244_v12 = vmul.f32 %v231_v37, %v225_v40  ;;  %v245_v13 = vmul.f32 %v235_v38, %v225_v40  ;;  %v1108_v39 = vld [vmem:[%s1438_s2 + $0x8] sm:$0xff]  }
  0x9a   : > { %v283_v53 = vadd.f32 %v275_v48, %v240_v43  ;;  %v284_v54 = vadd.f32 %v276_v49, %v241_v44 }
  0x9b   : > { %v220_v47 = vpop.permute.xlu0 %219 }
  0x9c   : > { %v260_v50 = vpop.permute.xlu1 %259  ;;  %v242_v58 = vmul.f32 %v231_v37, %v220_v47  ;;  %v243_v59 = vmul.f32 %v235_v38, %v220_v47  ;;  %v1107_v38 = vld [vmem:[%s1438_s2] sm:$0xff]  }
  0x9d   : > { %v279_v6 = vmul.f32 %v266_v41, %v260_v50  ;;  %v280_v7 = vmul.f32 %v270_v42, %v260_v50 }
  0x9e   : > { %v285_v10 = vadd.f32 %v277_v62, %v242_v58  ;;  %v286_v11 = vadd.f32 %v278_v63, %v243_v59 }
  0x9f   : > { %v301_v55 = vpop.permute.xlu0 %300  ;;  %v287_v21 = vadd.f32 %v279_v6, %v244_v12  ;;  %v288_v22 = vadd.f32 %v280_v7, %v245_v13 }
  0xa0   : > { %v315_v60 = vadd.f32 %v301_v55, %v283_v53  ;;  %v316_v61 = vadd.f32 %v301_v55, %v284_v54 }
  0xa1   : > { %v296_v0 = vpop.permute.xlu1 %295 }
  0xa2   : > { %v323_v1 = vmul.f32 0.01, %v315_v60  ;;  %v324_v2 = vmul.f32 0.01, %v316_v61  ;;  %v313_v3 = vadd.f32 %v296_v0, %v281_v56  ;;  %v314_v5 = vadd.f32 %v296_v0, %v282_v57 }
  0xa3   : > { %v353_v40 = vpop.permute.xlu0 %352 }
  0xa4   : > { %v321_v8 = vmul.f32 0.01, %v313_v3  ;;  %v322_v9 = vmul.f32 0.01, %v314_v5  ;;  %v332_v15 = vmax.f32 %v316_v61, %v324_v2  ;;  %v331_v16 = vmax.f32 %v315_v60, %v323_v1 }
  0xa5   : > { %v306_v14 = vpop.permute.xlu1 %305 }
  0xa6   : > { %v317_v17 = vadd.f32 %v306_v14, %v285_v10  ;;  %v318_v18 = vadd.f32 %v306_v14, %v286_v11  ;;  %v330_v19 = vmax.f32 %v314_v5, %v322_v9  ;;  %v329_v20 = vmax.f32 %v313_v3, %v321_v8 }
  0xa7   : > { %v363_v42 = vpop.permute.xlu0 %362 }
  0xa8   : > { %v342_v23 = vpack.c.bf16 %v332_v15, %v330_v19  ;;  %v341_v24 = vpack.c.bf16 %v331_v16, %v329_v20  ;;  %v325_v26 = vmul.f32 0.01, %v317_v17  ;;  %v326_v27 = vmul.f32 0.01, %v318_v18 }
  0xa9   : > { %v311_v25 = vpop.permute.xlu1 %310 }
  0xaa   : > { %v319_v28 = vadd.f32 %v311_v25, %v287_v21  ;;  %v320_v29 = vadd.f32 %v311_v25, %v288_v22  ;;  %387 = vmatprep.subr.bf16.mxu0 %v342_v23  ;;  %1056 = vmatprep.subr.bf16.mxu1 %v342_v23  ;;  %v333_v32 = vmax.f32 %v317_v17, %v325_v26  ;;  %v1109_v17 = vld [vmem:[%s1438_s2 + $0x10] sm:$0xff]  }
  0xab   : > { %388 = vmatpush1.bf16.msra.mxu0 %v341_v24  ;;  %1058 = vmatpush1.bf16.msra.mxu1 %v341_v24  ;;  %v334_v33 = vmax.f32 %v318_v18, %v326_v27  ;;  %v1110_v18 = vld [vmem:[%s1438_s2 + $0x18] sm:$0xff]   ;;  %v473_v19 = vpop.permute.xlu0 %472 }
  0xac   : > { %v327_v30 = vmul.f32 0.01, %v319_v28  ;;  %v328_v31 = vmul.f32 0.01, %v320_v29 }
  0xad   : > { %v358_v41 = vpop.permute.xlu1 %357 }
  0xae   : > { %v335_v34 = vmax.f32 %v319_v28, %v327_v30  ;;  %v336_v35 = vmax.f32 %v320_v29, %v328_v31 }
  0xb0   : > { %v344_v36 = vpack.c.bf16 %v336_v35, %v334_v33  ;;  %v343_v37 = vpack.c.bf16 %v335_v34, %v333_v32  ;;  %v483_v35 = vpop.permute.xlu0 %482 }
  0xb1   : > { %v368_v43 = vpop.permute.xlu1 %367 }
  0xb2   : > { %389 = vmatprep.subr.bf16.mxu0 %v344_v36  ;;  %1057 = vmatprep.subr.bf16.mxu1 %v344_v36 }
  0xb3   : > { %390 = vmatpush1.bf16.msra.mxu0 %v343_v37  ;;  %1059 = vmatpush1.bf16.msra.mxu1 %v343_v37 }
  0xb5   : > { %v478_v23 = vpop.permute.xlu1 %477 }
  0xb6   : > { %1000 = vmatmul.mubr.msk.bf16.vlgmr.msra.gmra.mrb[0].mxu0 %vm380_vm0, %v1107_v38  ;;  %1001 = vmatmul.mubr.msk.bf16.vlgmr.msra.gmra.mrb[0].mxu1 %vm380_vm0, %v1108_v39 }
  0xb7   : > { %538 = vmatprep.mubr.bf16.mxu1 %v1182_v4  ;;  %657 = vmatprep.mubr.bf16.mxu0 %v1182_v4 }
 0x189   : > { %v421_v44 = vpop.f32.mrb[0].mxu0  ;;  %v431_v45 = vpop.f32.mrb[0].mxu1 }
 0x18a   : > { %v422_v46 = vadd.f32 %v421_v44, %v353_v40  ;;  %v432_v47 = vadd.f32 %v431_v45, %v363_v42  ;;  %v423_v48 = vpop.f32.mrb[1].mxu0  ;;  %v433_v49 = vpop.f32.mrb[1].mxu1 }
 0x18b   : > { %v424_v50 = vadd.f32 %v423_v48, %v353_v40  ;;  %v434_v51 = vadd.f32 %v433_v49, %v363_v42  ;;  %v425_v52 = vpop.f32.mrb[2].mxu0  ;;  %v435_v53 = vpop.f32.mrb[2].mxu1 }
 0x18c   : > { %v440_v54 = vmul.f32 0.01, %v422_v46  ;;  %v444_v55 = vmul.f32 0.01, %v432_v47  ;;  %v426_v56 = vadd.f32 %v425_v52, %v358_v41  ;;  %v436_v57 = vadd.f32 %v435_v53, %v368_v43  ;;  %v427_v58 = vpop.f32.mrb[3].mxu0  ;;  %v437_v59 = vpop.f32.mrb[3].mxu1 }
 0x18d   : > { %v441_v60 = vmul.f32 0.01, %v424_v50  ;;  %v445_v61 = vmul.f32 0.01, %v434_v51  ;;  %v428_v62 = vadd.f32 %v427_v58, %v358_v41  ;;  %v438_v63 = vadd.f32 %v437_v59, %v368_v43  ;;  %v488_v42 = vpop.permute.xlu1 %487  ;;  %v1111_v59 = vld [vmem:[%s1438_s2 + $0x20] sm:$0xff]  }
 0x18e   : > { %v442_v0 = vmul.f32 0.01, %v426_v56  ;;  %v446_v1 = vmul.f32 0.01, %v436_v57  ;;  %v448_v5 = vmax.f32 %v422_v46, %v440_v54  ;;  %v452_v6 = vmax.f32 %v432_v47, %v444_v55 }
 0x18f   : > { %v443_v2 = vmul.f32 0.01, %v428_v62  ;;  %v447_v3 = vmul.f32 0.01, %v438_v63  ;;  %v449_v9 = vmax.f32 %v424_v50, %v441_v60  ;;  %v453_v10 = vmax.f32 %v434_v51, %v445_v61  ;;  %v1112_v60 = vld [vmem:[%s1438_s2 + $0x28] sm:$0xff]   ;;  %v592_v61 = vpop.permute.xlu0 %591 }
 0x190   : > { %v450_v7 = vmax.f32 %v426_v56, %v442_v0  ;;  %v454_v8 = vmax.f32 %v436_v57, %v446_v1 }
 0x191   : > { %v451_v11 = vmax.f32 %v428_v62, %v443_v2  ;;  %v455_v12 = vmax.f32 %v438_v63, %v447_v3  ;;  %v597_v1 = vpop.permute.xlu1 %596 }
 0x192   : > { %v461_v13 = vpack.c.bf16 %v450_v7, %v448_v5  ;;  %v463_v14 = vpack.c.bf16 %v454_v8, %v452_v6 }
 0x193   : > { %v462_v15 = vpack.c.bf16 %v451_v11, %v449_v9  ;;  %v464_v16 = vpack.c.bf16 %v455_v12, %v453_v10 }
 0x195   : > { %506 = vmatprep.subr.bf16.mxu1 %v462_v15 }
 0x196   : > { %507 = vmatpush1.bf16.msra.mxu1 %v461_v13 }
 0x197   : > { %508 = vmatprep.subr.bf16.mxu1 %v464_v16 }
 0x19a   : > { %509 = vmatpush1.bf16.msra.mxu1 %v463_v14  ;;  %v602_v14 = vpop.permute.xlu0 %601 }
 0x19d   : > { %1012 = vmatmul.mubr.msk.bf16.vlgmr.msra.gmra.mrb[4].mxu1 %vm380_vm0, %v1109_v17 }
 0x19e   : > { %548 = vmatprep.mubr.bf16.mxu1 %v1182_v4 }
 0x1a5   : > { %1013 = vmatmul.mubr.msk.bf16.gmra.mrb[8].mxu1 %vm380_vm0, %v1110_v18 }
 0x1a6   : > { %776 = vmatprep.mubr.bf16.mxu1 %v1182_v4 }
 0x270   : > { %v540_v20 = vpop.f32.mrb[4].mxu1 }
 0x271   : > { %v541_v21 = vadd.f32 %v540_v20, %v473_v19  ;;  %v542_v22 = vpop.f32.mrb[5].mxu1 }
 0x272   : > { %v543_v24 = vadd.f32 %v542_v22, %v473_v19  ;;  %v544_v25 = vpop.f32.mrb[6].mxu1 }
 0x273   : > { %v559_v26 = vmul.f32 0.01, %v541_v21  ;;  %v545_v27 = vadd.f32 %v544_v25, %v478_v23  ;;  %v546_v28 = vpop.f32.mrb[7].mxu1 }
 0x274   : > { %v560_v29 = vmul.f32 0.01, %v543_v24  ;;  %v547_v30 = vadd.f32 %v546_v28, %v478_v23 }
 0x275   : > { %v561_v31 = vmul.f32 0.01, %v545_v27  ;;  %v567_v33 = vmax.f32 %v541_v21, %v559_v26  ;;  %v607_v21 = vpop.permute.xlu1 %606 }
 0x276   : > { %v562_v32 = vmul.f32 0.01, %v547_v30  ;;  %v568_v36 = vmax.f32 %v543_v24, %v560_v29 }
 0x277   : > { %v569_v34 = vmax.f32 %v545_v27, %v561_v31 }
 0x278   : > { %v570_v37 = vmax.f32 %v547_v30, %v562_v32  ;;  %v550_v38 = vpop.f32.mrb[8].mxu1 }
 0x279   : > { %v580_v39 = vpack.c.bf16 %v569_v34, %v567_v33  ;;  %v551_v40 = vadd.f32 %v550_v38, %v483_v35  ;;  %v552_v41 = vpop.f32.mrb[9].mxu1  ;;  %v1113_v38 = vld [vmem:[%s1438_s2 + $0x30] sm:$0xff]  }
 0x27a   : > { %v553_v43 = vadd.f32 %v552_v41, %v483_v35  ;;  %v554_v44 = vpop.f32.mrb[10].mxu1  ;;  %v581_v45 = vpack.c.bf16 %v570_v37, %v568_v36 }
 0x27b   : > { %v563_v46 = vmul.f32 0.01, %v551_v40  ;;  %v555_v47 = vadd.f32 %v554_v44, %v488_v42  ;;  %v556_v48 = vpop.f32.mrb[11].mxu1  ;;  %v716_v44 = vpop.permute.xlu1 %715 }
 0x27c   : > { %v564_v49 = vmul.f32 0.01, %v553_v43  ;;  %v557_v50 = vadd.f32 %v556_v48, %v488_v42  ;;  %625 = vmatprep.subr.bf16.mxu0 %v581_v45 }
 0x27d   : > { %v565_v51 = vmul.f32 0.01, %v555_v47  ;;  %626 = vmatpush1.bf16.msra.mxu0 %v580_v39  ;;  %v571_v53 = vmax.f32 %v551_v40, %v563_v46  ;;  %v1114_v39 = vld [vmem:[%s1438_s2 + $0x38] sm:$0xff]   ;;  %v711_v40 = vpop.permute.xlu0 %710 }
 0x27e   : > { %v566_v52 = vmul.f32 0.01, %v557_v50  ;;  %v572_v55 = vmax.f32 %v553_v43, %v564_v49 }
 0x27f   : > { %v573_v54 = vmax.f32 %v555_v47, %v565_v51 }
 0x280   : > { %v574_v56 = vmax.f32 %v557_v50, %v566_v52 }
 0x281   : > { %v582_v57 = vpack.c.bf16 %v573_v54, %v571_v53 }
 0x282   : > { %v583_v58 = vpack.c.bf16 %v574_v56, %v572_v55  ;;  %v721_v56 = vpop.permute.xlu0 %720 }
 0x284   : > { %627 = vmatprep.subr.bf16.mxu0 %v583_v58 }
 0x285   : > { %628 = vmatpush1.bf16.msra.mxu0 %v582_v57 }
 0x288   : > { %1024 = vmatmul.mubr.msk.bf16.vlgmr.msra.gmra.mrb[4].mxu0 %vm380_vm0, %v1111_v59 }
 0x289   : > { %667 = vmatprep.mubr.bf16.mxu0 %v1182_v4 }
 0x290   : > { %1025 = vmatmul.mubr.msk.bf16.gmra.mrb[8].mxu0 %vm380_vm0, %v1112_v60 }
 0x291   : > { %892 = vmatprep.mubr.bf16.mxu0 %v1182_v4 }
 0x35b   : > { %v659_v62 = vpop.f32.mrb[4].mxu0 }
 0x35c   : > { %v660_v63 = vadd.f32 %v659_v62, %v592_v61  ;;  %v661_v0 = vpop.f32.mrb[5].mxu0 }
 0x35d   : > { %v662_v2 = vadd.f32 %v661_v0, %v592_v61  ;;  %v663_v3 = vpop.f32.mrb[6].mxu0 }
 0x35e   : > { %v678_v5 = vmul.f32 0.01, %v660_v63  ;;  %v664_v6 = vadd.f32 %v663_v3, %v597_v1  ;;  %v665_v7 = vpop.f32.mrb[7].mxu0 }
 0x35f   : > { %v679_v8 = vmul.f32 0.01, %v662_v2  ;;  %v666_v9 = vadd.f32 %v665_v7, %v597_v1 }
 0x360   : > { %v680_v10 = vmul.f32 0.01, %v664_v6  ;;  %v686_v12 = vmax.f32 %v660_v63, %v678_v5  ;;  %v726_v63 = vpop.permute.xlu1 %725 }
 0x361   : > { %v681_v11 = vmul.f32 0.01, %v666_v9  ;;  %v687_v15 = vmax.f32 %v662_v2, %v679_v8 }
 0x362   : > { %v688_v13 = vmax.f32 %v664_v6, %v680_v10 }
 0x363   : > { %v689_v16 = vmax.f32 %v666_v9, %v681_v11  ;;  %v669_v17 = vpop.f32.mrb[8].mxu0 }
 0x364   : > { %v699_v18 = vpack.c.bf16 %v688_v13, %v686_v12  ;;  %v670_v19 = vadd.f32 %v669_v17, %v602_v14  ;;  %v671_v20 = vpop.f32.mrb[9].mxu0  ;;  %v1115_v17 = vld [vmem:[%s1438_s2 + $0x40] sm:$0xff]  }
 0x365   : > { %v672_v22 = vadd.f32 %v671_v20, %v602_v14  ;;  %v673_v23 = vpop.f32.mrb[10].mxu0  ;;  %v700_v24 = vpack.c.bf16 %v689_v16, %v687_v15 }
 0x366   : > { %v682_v25 = vmul.f32 0.01, %v670_v19  ;;  %v674_v26 = vadd.f32 %v673_v23, %v607_v21  ;;  %v675_v27 = vpop.f32.mrb[11].mxu0 }
 0x367   : > { %v683_v28 = vmul.f32 0.01, %v672_v22  ;;  %v676_v29 = vadd.f32 %v675_v27, %v607_v21  ;;  %744 = vmatprep.subr.bf16.mxu1 %v700_v24 }
 0x368   : > { %v684_v30 = vmul.f32 0.01, %v674_v26  ;;  %745 = vmatpush1.bf16.msra.mxu1 %v699_v18  ;;  %v690_v32 = vmax.f32 %v670_v19, %v682_v25  ;;  %v1116_v18 = vld [vmem:[%s1438_s2 + $0x48] sm:$0xff]   ;;  %v830_v19 = vpop.permute.xlu0 %829 }
 0x369   : > { %v685_v31 = vmul.f32 0.01, %v676_v29  ;;  %v691_v34 = vmax.f32 %v672_v22, %v683_v28 }
 0x36a   : > { %v692_v33 = vmax.f32 %v674_v26, %v684_v30 }
 0x36b   : > { %v693_v35 = vmax.f32 %v676_v29, %v685_v31 }
 0x36c   : > { %v701_v36 = vpack.c.bf16 %v692_v33, %v690_v32 }
 0x36d   : > { %v702_v37 = vpack.c.bf16 %v693_v35, %v691_v34 }
 0x36f   : > { %746 = vmatprep.subr.bf16.mxu1 %v702_v37 }
 0x370   : > { %747 = vmatpush1.bf16.msra.mxu1 %v701_v36 }
 0x373   : > { %1036 = vmatmul.mubr.msk.bf16.vlgmr.msra.gmra.mrb[12].mxu1 %vm380_vm0, %v1113_v38 }
 0x374   : > { %786 = vmatprep.mubr.bf16.mxu1 %v1182_v4 }
 0x37b   : > { %1037 = vmatmul.mubr.msk.bf16.gmra.mrb[16].mxu1 %vm380_vm0, %v1114_v39 }
 0x446   : > { %v778_v41 = vpop.f32.mrb[12].mxu1 }
 0x447   : > { %v779_v42 = vadd.f32 %v778_v41, %v711_v40  ;;  %v780_v43 = vpop.f32.mrb[13].mxu1 }
 0x448   : > { %v781_v45 = vadd.f32 %v780_v43, %v711_v40  ;;  %v782_v46 = vpop.f32.mrb[14].mxu1 }
 0x449   : > { %v797_v47 = vmul.f32 0.01, %v779_v42  ;;  %v783_v48 = vadd.f32 %v782_v46, %v716_v44  ;;  %v784_v49 = vpop.f32.mrb[15].mxu1 }
 0x44a   : > { %v798_v50 = vmul.f32 0.01, %v781_v45  ;;  %v785_v51 = vadd.f32 %v784_v49, %v716_v44 }
 0x44b   : > { %v799_v52 = vmul.f32 0.01, %v783_v48  ;;  %v805_v54 = vmax.f32 %v779_v42, %v797_v47 }
 0x44c   : > { %v800_v53 = vmul.f32 0.01, %v785_v51  ;;  %v806_v57 = vmax.f32 %v781_v45, %v798_v50 }
 0x44d   : > { %v807_v55 = vmax.f32 %v783_v48, %v799_v52 }
 0x44e   : > { %v808_v58 = vmax.f32 %v785_v51, %v800_v53  ;;  %v788_v59 = vpop.f32.mrb[16].mxu1 }
 0x44f   : > { %v818_v60 = vpack.c.bf16 %v807_v55, %v805_v54  ;;  %v789_v61 = vadd.f32 %v788_v59, %v721_v56  ;;  %v790_v62 = vpop.f32.mrb[17].mxu1 }
 0x450   : > { %v791_v0 = vadd.f32 %v790_v62, %v721_v56  ;;  %v792_v1 = vpop.f32.mrb[18].mxu1  ;;  %v819_v2 = vpack.c.bf16 %v808_v58, %v806_v57 }
 0x451   : > { %v801_v3 = vmul.f32 0.01, %v789_v61  ;;  %v793_v5 = vadd.f32 %v792_v1, %v726_v63  ;;  %v794_v6 = vpop.f32.mrb[19].mxu1 }
 0x452   : > { %v802_v7 = vmul.f32 0.01, %v791_v0  ;;  %v795_v8 = vadd.f32 %v794_v6, %v726_v63  ;;  %860 = vmatprep.subr.bf16.mxu0 %v819_v2 }
 0x453   : > { %v803_v9 = vmul.f32 0.01, %v793_v5  ;;  %861 = vmatpush1.bf16.msra.mxu0 %v818_v60  ;;  %v809_v11 = vmax.f32 %v789_v61, %v801_v3 }
 0x454   : > { %v804_v10 = vmul.f32 0.01, %v795_v8  ;;  %v810_v13 = vmax.f32 %v791_v0, %v802_v7 }
 0x455   : > { %v811_v12 = vmax.f32 %v793_v5, %v803_v9 }
 0x456   : > { %v812_v14 = vmax.f32 %v795_v8, %v804_v10 }
 0x457   : > { %v820_v15 = vpack.c.bf16 %v811_v12, %v809_v11 }
 0x458   : > { %v821_v16 = vpack.c.bf16 %v812_v14, %v810_v13 }
 0x45a   : > { %862 = vmatprep.subr.bf16.mxu0 %v821_v16 }
 0x45b   : > { %863 = vmatpush1.bf16.msra.mxu0 %v820_v15 }
 0x45e   : > { %1048 = vmatmul.mubr.msk.bf16.vlgmr.msra.gmra.mrb[12].mxu0 %vm380_vm0, %v1115_v17 }
 0x45f   : > { %900 = vmatprep.mubr.bf16.mxu0 %v1182_v4 }
 0x466   : > { %1049 = vmatmul.mubr.msk.bf16.gmra.mrb[16].mxu0 %vm380_vm0, %v1116_v18 }
 0x531   : > { %v894_v20 = vpop.f32.mrb[12].mxu0 }
 0x532   : > { %v895_v21 = vadd.f32 %v894_v20, %v830_v19  ;;  %v896_v22 = vpop.f32.mrb[13].mxu0 }
 0x533   : > { %v897_v23 = vadd.f32 %v896_v22, %v830_v19  ;;  %v898_v24 = vpop.f32.mrb[14].mxu0 }
 0x534   : > { %v899_v25 = vpop.f32.mrb[15].mxu0 }
 0x535   : > { %v909_v4 = vcombine.low %v895_v21, %v897_v23 }
 0x537   : > { %911 = vst [vmem:[%s191_s11] sm:$0xff] %v909_v4 }
 0x538   : > { %1130 = shalt.err (!%p1127_p3)
}
 0x539   : > { %s1131_s29 = scalar_lea.hbm %s1394_s20, 128  ;;  %s1135_s6 = scalar_lea.hbm %s1440_s4, 256 }
 0x53a   : > { %p1132_p4 = scmp.ne.s32.totalorder %s1394_s20, %s1131_s29  ;;  %p1136_p9 = scmp.lt.u32.totalorder %s1394_s20, %s1440_s4 }
 0x53b   : > { %p1137_p10 = scmp.lt.u32.totalorder %s1135_s6, %s1131_s29  ;;  %p1139_p12 = scmp.lt.u32.totalorder %s1131_s29, %s1394_s20 }
 0x53c   : > { %p1133_p7 = pnand %p1132_p4, %p1247_p5 }
 0x53d   : > { %p1138_p11 = por %p1137_p10, %p1136_p9 }
 0x53e   : > { %p1134_p8 = pneg %p1133_p7 }
 0x53f   : > { %p1140_p13 = por %p1139_p12, %p1138_p11 }
 0x541   : > { %p1141_p0 = pnand %p1140_p13, %p1134_p8 }
 0x543   : > { %1144 = shalt.err (!%p1141_p0)
}
 0x544   : > { %1060 = dma.vmem_to_hbm [thread:$0]  (%p1247_p5), %s1396_s12, 128, %s1394_s20, %s913_s22   ;;  %v902_v26 = vpop.f32.mrb[16].mxu0 }
 0x545   : > { %v903_v27 = vpop.f32.mrb[17].mxu0 }
 0x546   : > { %v904_v28 = vpop.f32.mrb[18].mxu0 }
 0x547   : > { %v905_v29 = vpop.f32.mrb[19].mxu0 }
 0x548 PF: > { %p1066_p1 = scmp.ge.s32.totalorder %s1179_s18, 2  ;;  %s939_s9 = sand.u32 1, %s1167_s15  }
 0x549   : > { %s940_s10 = scalar_lea.sflag [#allocation3], %s939_s9 }
 0x54a   : > { %p1063_p2 = pnand %p1066_p1, %p1251_p6 }
 0x54c   : > { %1162 = dma.done.wait (!%p1063_p2), %s940_s10, 128  }
 0x54d   : > { %1164 = vsyncadd (!%p1063_p2), %s940_s10, 4294967168  ;;  %p14_p5 = scmp.ge.s32.totalorder %s1234_s21, 4   ;;  %s1443_s15 = smov %s1171_s16 }
 0x54e   : > { %s1444_s16 = smov %s1175_s17  ;;  %s1445_s17 = smov %s1245_s24 }
 0x54f   : > { %s1446_s18 = smov %s1234_s21  ;;  %16 = sbr.rel (!%p14_p5) target bundleno = 3 (0x3), region = 81 }
 0x556   :  { %945 = vsyncpa [#allocation3], 1 }
 0x557   :  { %947 = vsyncpa [#allocation3 + $0x1], 1 }

</bundles_post_ra>
